<compile_context>
chip_gen: v6e
topology: v6e:2x2x1
jax: 0.10.0
libtpu: 0.0.40
codegen_flags: <defaults>
</compile_context>

<pallas_src>
import functools

import jax
import jax.numpy as jnp
from jax import lax
from jax.experimental import pallas as pl
from jax.experimental.pallas import tpu as pltpu

LANE = 128  # TPU lane width (last-dim tiling unit)


def _round_up(v, m):
    return (v + m - 1) // m * m


@functools.lru_cache(maxsize=1)
def _default_batch_tile():
    """Generation-aware batch tile: bigger tiles on faster-HBM / bigger-VMEM chips."""
    try:
        kind = jax.devices()[0].device_kind.lower()
    except Exception:  # pragma: no cover - CPU interpret etc.
        return 1024
    if "v5" in kind:
        return 1024
    if "v6" in kind:
        return 2048
    if "v7" in kind or "7x" in kind:
        return 4096
    return 1024


def linear_kernel(x_ref, w_ref, b_ref, o_ref):
    # x_ref: (bm, K)   w_ref: (N_pad, K)   b_ref: (1, N_pad)   o_ref: (bm, N_pad)
    # Contract on the shared K axis (transposed-RHS matmul -- native on the MXU),
    # accumulate in f32, add bias, store a lane-dense f32 output tile.
    x = x_ref[...]
    w = w_ref[...]
    if x.dtype != w.dtype:
        # In-kernel cast (VPU) -- avoids materializing a casted copy of x in HBM.
        x = x.astype(w.dtype)
    acc = lax.dot_general(
        x, w,
        dimension_numbers=(((1,), (1,)), ((), ())),
        preferred_element_type=jnp.float32,
    )
    o_ref[...] = acc + b_ref[...]


def prepare_params(weight, bias, param_dtype=jnp.float32):
    """One-time parameter prep (hoisted off the per-forward hot path).

    Keeps the native (out_dim, in_dim) layout (no transpose) and zero-pads the
    output dim up to a multiple of 128 so the kernel's stores are lane-dense.
    """
    n, k = weight.shape
    n_pad = _round_up(n, LANE)
    w_p = jnp.zeros((n_pad, k), param_dtype).at[:n, :].set(weight.astype(param_dtype))
    b_p = jnp.zeros((1, n_pad), jnp.float32).at[0, :n].set(bias.astype(jnp.float32))
    return w_p, b_p


@functools.partial(jax.jit, static_argnames=("n_out", "bm", "trim_lanes"))
def _mclr_forward_impl(x, w_padded, b_padded, n_out, bm, trim_lanes):
    B = x.shape[0]
    x2d = x.reshape(B, -1)                 # torch.flatten(x, 1); cast happens in-kernel
    K = x2d.shape[1]
    n_pad = w_padded.shape[0]

    # Batch tiling: one full block for small B; otherwise bm-row tiles with a
    # ragged last tile handled by Pallas (no wrapper-side pad / extra HBM pass).
    bm_eff = B if B <= bm else bm
    grid = (pl.cdiv(B, bm_eff),)

    x_bytes = x2d.dtype.itemsize
    w_bytes = w_padded.dtype.itemsize

    # VMEM budget: x + out double-buffered, weight + bias single-buffered.
    vmem_needed = (2 * bm_eff * K * x_bytes
                   + 2 * bm_eff * n_pad * 4
                   + n_pad * K * w_bytes
                   + n_pad * 4)
    vmem_limit = min(int(vmem_needed * 1.25) + (2 << 20), 60 << 20)

    flops = 2 * B * K * n_pad
    bytes_accessed = (B * K * x_bytes          # x read (once)
                      + n_pad * K * w_bytes    # weight read (resident)
                      + n_pad * 4              # bias
                      + B * n_pad * 4)         # output write

    out = pl.pallas_call(
        linear_kernel,
        out_shape=jax.ShapeDtypeStruct((B, n_pad), jnp.float32),
        grid_spec=pl.GridSpec(
            grid=grid,
            in_specs=[
                # x: streamed over batch tiles (double-buffered by default).
                pl.BlockSpec((bm_eff, K), lambda i: (i, 0)),
                # weight / bias: constant-index, VMEM-resident, single-buffered.
                pl.BlockSpec((n_pad, K), lambda i: (0, 0),
                             pipeline_mode=pl.Buffered(1)),
                pl.BlockSpec((1, n_pad), lambda i: (0, 0),
                             pipeline_mode=pl.Buffered(1)),
            ],
            out_specs=pl.BlockSpec((bm_eff, n_pad), lambda i: (i, 0)),
        ),
        compiler_params=pltpu.CompilerParams(
            dimension_semantics=("parallel",),
            vmem_limit_bytes=vmem_limit,
        ),
        cost_estimate=pl.CostEstimate(
            flops=flops, transcendentals=0, bytes_accessed=bytes_accessed),
    )(x2d, w_padded, b_padded)

    if trim_lanes:
        # Tiny lane slice back to the logical output dim (keeps module semantics).
        return out[:, :n_out]
    # Consumers that fuse the :n_out slice themselves (e.g. a CE kernel) can
    # take the lane-padded logits and skip this copy.
    return out


def mclr_forward(x, w_padded, b_padded, n_out, *, bm=None, trim_lanes=True):
    """x: (B, ...) -> flatten(1) -> Linear. Returns (B, n_out) float32 logits."""
    if bm is None:
        bm = _default_batch_tile()
    return _mclr_forward_impl(x, w_padded, b_padded, n_out, bm, trim_lanes)


if __name__ == "__main__":
    input_dim = 784
    output_dim = 10
    batch = 8

    key = jax.random.PRNGKey(0)
    kx, kw, kb = jax.random.split(key, 3)

    # Deterministic parameter init mirroring nn.Linear's uniform(-1/sqrt(in), 1/sqrt(in))
    bound = 1.0 / jnp.sqrt(jnp.float32(input_dim))
    weight = jax.random.uniform(kw, (output_dim, input_dim), jnp.float32, -bound, bound)
    bias = jax.random.uniform(kb, (output_dim,), jnp.float32, -bound, bound)

    # Input as MNIST-like NCHW images; forward flattens from dim 1 -> 784 features.
    x = jax.random.normal(kx, (batch, 1, 28, 28), jnp.float32)

    # One-time parameter prep (off the per-forward critical path).
    w_p, b_p = prepare_params(weight, bias)

    out = mclr_forward(x, w_p, b_p, output_dim)
    out = jax.block_until_ready(out)

    # Reference check in plain JAX (forward returns logits, matching the module).
    ref = x.reshape(batch, -1) @ weight.T + bias
    assert out.shape == (batch, output_dim)
    assert jnp.allclose(out, ref, atol=1e-4, rtol=1e-4)

    print("KERNEL_OK")
</pallas_src>

<mosaic_0001>
module attributes {stable_mosaic.version = 11 : i64} {
  func.func @linear_kernel(%arg0: i32, %arg1: memref<8x784xf32, #tpu.memory_space<vmem>>, %arg2: memref<128x784xf32, #tpu.memory_space<vmem>>, %arg3: memref<1x128xf32, #tpu.memory_space<vmem>>, %arg4: memref<8x128xf32, #tpu.memory_space<vmem>>) attributes {dimension_semantics = [#tpu.dimension_semantics<parallel>], iteration_bounds = array<i64: 1>, scalar_prefetch = 0 : i64, scratch_operands = 0 : i64, tpu.core_type = #tpu.core_type<tc>, window_params = [{transform_indices = @transform_0, window_bounds = array<i64: 8, 784>}, {pipeline_mode = #tpu.pipeline_mode<synchronous>, transform_indices = @transform_1, window_bounds = array<i64: 128, 784>}, {pipeline_mode = #tpu.pipeline_mode<synchronous>, transform_indices = @transform_2, window_bounds = array<i64: 1, 128>}, {transform_indices = @transform_3, window_bounds = array<i64: 8, 128>}]} {
    %c0 = arith.constant 0 : index
    %c0_0 = arith.constant 0 : index
    %0 = vector.load %arg1[%c0, %c0_0] : memref<8x784xf32, #tpu.memory_space<vmem>>, vector<8x784xf32>
    %c0_1 = arith.constant 0 : index
    %c0_2 = arith.constant 0 : index
    %1 = vector.load %arg2[%c0_1, %c0_2] : memref<128x784xf32, #tpu.memory_space<vmem>>, vector<128x784xf32>
    %cst = arith.constant dense<0.000000e+00> : vector<8x128xf32>
    %2 = tpu.matmul %0, %1, %cst {dimension_numbers = #tpu.dot_dimension_numbers<[1], [1], [0], [0], [0, 0, 1, 0], [], []>} : vector<8x784xf32>, vector<128x784xf32>, vector<8x128xf32> -> vector<8x128xf32>
    %c0_3 = arith.constant 0 : index
    %c0_4 = arith.constant 0 : index
    %3 = vector.load %arg3[%c0_3, %c0_4] : memref<1x128xf32, #tpu.memory_space<vmem>>, vector<1x128xf32>
    %4 = vector.broadcast %3 : vector<1x128xf32> to vector<8x128xf32>
    %5 = arith.addf %2, %4 : vector<8x128xf32>
    %c0_5 = arith.constant 0 : index
    %c0_6 = arith.constant 0 : index
    %6 = vector.load %arg4[%c0_5, %c0_6] : memref<8x128xf32, #tpu.memory_space<vmem>>, vector<8x128xf32>
    tpu.vector_store %arg4[%c0_5, %c0_6], %5 {strides = array<i32>} : memref<8x128xf32, #tpu.memory_space<vmem>>, vector<8x128xf32>,
    return
  }
  func.func @transform_0(%arg0: i32) -> (i32, i32) {
    %c0_i32 = arith.constant 0 : i32
    %c0_i32_0 = arith.constant 0 : i32
    return %arg0, %c0_i32 : i32, i32
  }
  func.func @transform_1(%arg0: i32) -> (i32, i32) {
    %c0_i32 = arith.constant 0 : i32
    %c0_i32_0 = arith.constant 0 : i32
    %c0_i32_1 = arith.constant 0 : i32
    return %c0_i32, %c0_i32_0 : i32, i32
  }
  func.func @transform_2(%arg0: i32) -> (i32, i32) {
    %c0_i32 = arith.constant 0 : i32
    %c0_i32_0 = arith.constant 0 : i32
    %c0_i32_1 = arith.constant 0 : i32
    return %c0_i32, %c0_i32_0 : i32, i32
  }
  func.func @transform_3(%arg0: i32) -> (i32, i32) {
    %c0_i32 = arith.constant 0 : i32
    %c0_i32_0 = arith.constant 0 : i32
    return %arg0, %c0_i32 : i32, i32
  }
}

</mosaic_0001>

<bundles_post_ra>
// kernel: _mclr_forward_impl.1
= control target key start
LH: loop header
LB: loop body
LE: loop exit
PB: predicated region body
PF: predicated region fallthrough
CT: control target
= control target key end

     0   :  { %s1003_s0 = inlined_call_operand.vmem [shape: f32[8,784], index: 0, kind: input, shape index: {}]   ;;  %s1004_s1 = inlined_call_operand.vmem [shape: f32[128,784], index: 1, kind: input, shape index: {}]   ;;  %s1005_s2 = inlined_call_operand.vmem [shape: f32[1,128], index: 2, kind: input, shape index: {}]   ;;  %s1006_s3 = inlined_call_operand.hbm [shape: f32[8,128], index: 3, kind: output, shape index: {}]  }
   0x1   :  { %v128_v0 = vld [vmem:[%s1004_s1 + $0x350] sm:$0xff]  ;;  %v130_v1 = vld [vmem:[%s1004_s1 + $0x360] sm:$0xff]  ;;  %v127_v2 = vld [vmem:[%s1004_s1 + $0x348] sm:$0xff] }
   0x2   :  { %193 = vmatprep.subr.mxu0 %v128_v0  ;;  %263 = vmatprep.subr.mxu1 %v130_v1  ;;  %v129_v3 = vld [vmem:[%s1004_s1 + $0x358] sm:$0xff]  ;;  %v123_v5 = vld [vmem:[%s1004_s1 + $0x328] sm:$0xff]  ;;  %v120_v6 = vld [vmem:[%s1004_s1 + $0x310] sm:$0xff] }
   0x3   :  { %v121_v4 = vld [vmem:[%s1004_s1 + $0x318] sm:$0xff]  ;;  %194 = vmatpush1.xpose.msra.mxu0 %v127_v2  ;;  %264 = vmatpush1.xpose.msra.mxu1 %v129_v3  ;;  %v122_v7 = vld [vmem:[%s1004_s1 + $0x320] sm:$0xff]  ;;  %v116_v9 = vld [vmem:[%s1004_s1 + $0x2f0] sm:$0xff] }
   0x4   :  { %195 = vmatprep.subr.mxu0 %v121_v4  ;;  %265 = vmatprep.subr.mxu1 %v123_v5  ;;  %v114_v8 = vld [vmem:[%s1004_s1 + $0x2e0] sm:$0xff]  ;;  %v113_v10 = vld [vmem:[%s1004_s1 + $0x2d8] sm:$0xff]  ;;  %v115_v11 = vld [vmem:[%s1004_s1 + $0x2e8] sm:$0xff] }
   0x5   :  { %v107_v12 = vld [vmem:[%s1004_s1 + $0x2a8] sm:$0xff]  ;;  %v109_v13 = vld [vmem:[%s1004_s1 + $0x2b8] sm:$0xff]  ;;  %v106_v14 = vld [vmem:[%s1004_s1 + $0x2a0] sm:$0xff] }
   0x6   :  { %v108_v15 = vld [vmem:[%s1004_s1 + $0x2b0] sm:$0xff]  ;;  %v102_v17 = vld [vmem:[%s1004_s1 + $0x280] sm:$0xff]  ;;  %v99_v18 = vld [vmem:[%s1004_s1 + $0x268] sm:$0xff] }
   0x7   :  { %196 = vmatpush1.xpose.msra.mxu0 %v120_v6  ;;  %266 = vmatpush1.xpose.msra.mxu1 %v122_v7  ;;  %v100_v16 = vld [vmem:[%s1004_s1 + $0x270] sm:$0xff]  ;;  %v101_v19 = vld [vmem:[%s1004_s1 + $0x278] sm:$0xff]  ;;  %v95_v21 = vld [vmem:[%s1004_s1 + $0x248] sm:$0xff] }
   0x8   :  { %197 = vmatprep.subr.mxu0 %v114_v8  ;;  %267 = vmatprep.subr.mxu1 %v116_v9  ;;  %v93_v20 = vld [vmem:[%s1004_s1 + $0x238] sm:$0xff]  ;;  %v92_v22 = vld [vmem:[%s1004_s1 + $0x230] sm:$0xff]  ;;  %v94_v23 = vld [vmem:[%s1004_s1 + $0x240] sm:$0xff] }
   0x9   :  { %v86_v24 = vld [vmem:[%s1004_s1 + $0x200] sm:$0xff]  ;;  %v88_v25 = vld [vmem:[%s1004_s1 + $0x210] sm:$0xff]  ;;  %v16_v26 = vld [vmem:[%s1003_s0 + $0x8] sm:$0xff] }
   0xa   :  { %v18_v27 = vld [vmem:[%s1003_s0 + $0x18] sm:$0xff]  ;;  %v87_v29 = vld [vmem:[%s1004_s1 + $0x208] sm:$0xff]  ;;  %257 = vmatprep.mubr.f32.mxu0 %v16_v26  ;;  %v78_v32 = vld [vmem:[%s1004_s1 + $0x1c0] sm:$0xff] }
   0xb   :  { %198 = vmatpush1.xpose.msra.mxu0 %v113_v10  ;;  %268 = vmatpush1.xpose.msra.mxu1 %v115_v11  ;;  %v85_v28 = vld [vmem:[%s1004_s1 + $0x1f8] sm:$0xff]  ;;  %v79_v30 = vld [vmem:[%s1004_s1 + $0x1c8] sm:$0xff]  ;;  %v80_v33 = vld [vmem:[%s1004_s1 + $0x1d0] sm:$0xff] }
   0xc   :  { %199 = vmatprep.subr.mxu0 %v107_v12  ;;  %269 = vmatprep.subr.mxu1 %v109_v13  ;;  %v81_v31 = vld [vmem:[%s1004_s1 + $0x1d8] sm:$0xff]  ;;  %v72_v34 = vld [vmem:[%s1004_s1 + $0x190] sm:$0xff]  ;;  %v74_v35 = vld [vmem:[%s1004_s1 + $0x1a0] sm:$0xff] }
   0xd   :  { %327 = vmatprep.mubr.f32.mxu1 %v18_v27  ;;  %v71_v36 = vld [vmem:[%s1004_s1 + $0x188] sm:$0xff]  ;;  %v73_v37 = vld [vmem:[%s1004_s1 + $0x198] sm:$0xff]  ;;  %v64_v40 = vld [vmem:[%s1004_s1 + $0x150] sm:$0xff] }
   0xe   :  { %v65_v38 = vld [vmem:[%s1004_s1 + $0x158] sm:$0xff]  ;;  %v67_v39 = vld [vmem:[%s1004_s1 + $0x168] sm:$0xff]  ;;  %v66_v41 = vld [vmem:[%s1004_s1 + $0x160] sm:$0xff] }
   0xf   :  { %200 = vmatpush1.xpose.msra.mxu0 %v106_v14  ;;  %270 = vmatpush1.xpose.msra.mxu1 %v108_v15  ;;  %v58_v42 = vld [vmem:[%s1004_s1 + $0x120] sm:$0xff]  ;;  %v60_v43 = vld [vmem:[%s1004_s1 + $0x130] sm:$0xff]  ;;  %v57_v44 = vld [vmem:[%s1004_s1 + $0x118] sm:$0xff] }
  0x10   :  { %201 = vmatprep.subr.mxu0 %v100_v16  ;;  %271 = vmatprep.subr.mxu1 %v102_v17  ;;  %v59_v45 = vld [vmem:[%s1004_s1 + $0x128] sm:$0xff]  ;;  %v53_v47 = vld [vmem:[%s1004_s1 + $0xf8] sm:$0xff] }
  0x11   :  { %v51_v46 = vld [vmem:[%s1004_s1 + $0xe8] sm:$0xff] }
  0x13   :  { %202 = vmatpush1.xpose.msra.mxu0 %v99_v18  ;;  %272 = vmatpush1.xpose.msra.mxu1 %v101_v19 }
  0x14   :  { %203 = vmatprep.subr.mxu0 %v93_v20  ;;  %273 = vmatprep.subr.mxu1 %v95_v21 }
  0x17   :  { %204 = vmatpush1.xpose.msra.mxu0 %v92_v22  ;;  %274 = vmatpush1.xpose.msra.mxu1 %v94_v23 }
  0x18   :  { %205 = vmatprep.subr.mxu0 %v86_v24  ;;  %275 = vmatprep.subr.mxu1 %v88_v25 }
  0x1b   :  { %206 = vmatpush1.xpose.msra.mxu0 %v85_v28  ;;  %276 = vmatpush1.xpose.msra.mxu1 %v87_v29 }
  0x1c   :  { %207 = vmatprep.subr.mxu0 %v79_v30  ;;  %277 = vmatprep.subr.mxu1 %v81_v31 }
  0x1f   :  { %208 = vmatpush1.xpose.msra.mxu0 %v78_v32  ;;  %278 = vmatpush1.xpose.msra.mxu1 %v80_v33 }
  0x20   :  { %209 = vmatprep.subr.mxu0 %v72_v34  ;;  %279 = vmatprep.subr.mxu1 %v74_v35 }
  0x23   :  { %210 = vmatpush1.xpose.msra.mxu0 %v71_v36  ;;  %280 = vmatpush1.xpose.msra.mxu1 %v73_v37 }
  0x24   :  { %211 = vmatprep.subr.mxu0 %v65_v38  ;;  %281 = vmatprep.subr.mxu1 %v67_v39 }
  0x27   :  { %212 = vmatpush1.xpose.msra.mxu0 %v64_v40  ;;  %282 = vmatpush1.xpose.msra.mxu1 %v66_v41 }
  0x28   :  { %213 = vmatprep.subr.mxu0 %v58_v42  ;;  %283 = vmatprep.subr.mxu1 %v60_v43 }
  0x29   :  { %8 = vsyncpa [#allocation3], 0  ;;  %v50_v48 = vld [vmem:[%s1004_s1 + $0xe0] sm:$0xff]  ;;  %v52_v49 = vld [vmem:[%s1004_s1 + $0xf0] sm:$0xff]  ;;  %v583_v5 = vmov 0.0   ;;  %vm141_vm0 = vcmask 130048  }
  0x2a   :  { %v44_v50 = vld [vmem:[%s1004_s1 + $0xb0] sm:$0xff]  ;;  %v46_v51 = vld [vmem:[%s1004_s1 + $0xc0] sm:$0xff]  ;;  %v43_v52 = vld [vmem:[%s1004_s1 + $0xa8] sm:$0xff]  ;;  %vm584_vm1 = vmmov 0   ;;  %s585_s8 = smov [#allocation2]  }
  0x2b   :  { %214 = vmatpush1.xpose.msra.mxu0 %v57_v44  ;;  %284 = vmatpush1.xpose.msra.mxu1 %v59_v45  ;;  %v45_v53 = vld [vmem:[%s1004_s1 + $0xb8] sm:$0xff]  ;;  %v39_v55 = vld [vmem:[%s1004_s1 + $0x88] sm:$0xff]  ;;  %v36_v56 = vld [vmem:[%s1004_s1 + $0x70] sm:$0xff]  ;;  %s480_s9 = sshll.u32 %s585_s8, 4  ;;  %s481_s9 = int_to_ptr.vmem [resolvable:$true] %s480_s9 }
  0x2c   :  { %215 = vmatprep.subr.mxu0 %v51_v46  ;;  %285 = vmatprep.subr.mxu1 %v53_v47  ;;  %v37_v54 = vld [vmem:[%s1004_s1 + $0x78] sm:$0xff]  ;;  %v38_v57 = vld [vmem:[%s1004_s1 + $0x80] sm:$0xff]  ;;  %v32_v59 = vld [vmem:[%s1004_s1 + $0x50] sm:$0xff]  ;;  %p566_p1 = scmp.lt.s32.totalorder %s481_s9, %s481_s9 }
  0x2d   :  { %v30_v58 = vld [vmem:[%s1004_s1 + $0x40] sm:$0xff]  ;;  %v29_v60 = vld [vmem:[%s1004_s1 + $0x38] sm:$0xff]  ;;  %v31_v61 = vld [vmem:[%s1004_s1 + $0x48] sm:$0xff] }
  0x2e   :  { %v23_v62 = vld [vmem:[%s1004_s1 + $0x8] sm:$0xff]  ;;  %v25_v63 = vld [vmem:[%s1004_s1 + $0x18] sm:$0xff]  ;;  %v22_v0 = vld [vmem:[%s1004_s1] sm:$0xff] }
  0x2f   :  { %216 = vmatpush1.xpose.msra.mxu0 %v50_v48  ;;  %286 = vmatpush1.xpose.msra.mxu1 %v52_v49  ;;  %v24_v1 = vld [vmem:[%s1004_s1 + $0x10] sm:$0xff]  ;;  %v15_v3 = vld [vmem:[%s1003_s0] sm:$0xff]  ;;  %v131_v6 = vld [vmem:[%s1004_s1 + $0x368] sm:$0xff] }
  0x30   :  { %217 = vmatprep.subr.mxu0 %v44_v50  ;;  %287 = vmatprep.subr.mxu1 %v46_v51  ;;  %v132_v2 = vld [vmem:[%s1004_s1 + $0x370] sm:$0xff]  ;;  %v133_v7 = vld [vmem:[%s1004_s1 + $0x378] sm:$0xff]  ;;  %v20_v9 = vld [vmem:[%s1003_s0 + $0x28] sm:$0xff] }
  0x31   :  { %v17_v4 = vld [vmem:[%s1003_s0 + $0x10] sm:$0xff]  ;;  %v125_v8 = vld [vmem:[%s1004_s1 + $0x338] sm:$0xff]  ;;  %v126_v11 = vld [vmem:[%s1004_s1 + $0x340] sm:$0xff] }
  0x32   :  { %v124_v10 = vld [vmem:[%s1004_s1 + $0x330] sm:$0xff]  ;;  %v118_v12 = vld [vmem:[%s1004_s1 + $0x300] sm:$0xff]  ;;  %v117_v13 = vld [vmem:[%s1004_s1 + $0x2f8] sm:$0xff] }
  0x33   :  { %218 = vmatpush1.xpose.msra.mxu0 %v43_v52  ;;  %288 = vmatpush1.xpose.msra.mxu1 %v45_v53  ;;  %v119_v14 = vld [vmem:[%s1004_s1 + $0x308] sm:$0xff]  ;;  %v110_v16 = vld [vmem:[%s1004_s1 + $0x2c0] sm:$0xff]  ;;  %v112_v17 = vld [vmem:[%s1004_s1 + $0x2d0] sm:$0xff] }
  0x34   :  { %219 = vmatprep.subr.mxu0 %v37_v54  ;;  %289 = vmatprep.subr.mxu1 %v39_v55  ;;  %v111_v15 = vld [vmem:[%s1004_s1 + $0x2c8] sm:$0xff]  ;;  %v104_v18 = vld [vmem:[%s1004_s1 + $0x290] sm:$0xff]  ;;  %v105_v20 = vld [vmem:[%s1004_s1 + $0x298] sm:$0xff] }
  0x35   :  { %v103_v19 = vld [vmem:[%s1004_s1 + $0x288] sm:$0xff]  ;;  %v97_v21 = vld [vmem:[%s1004_s1 + $0x258] sm:$0xff]  ;;  %v96_v22 = vld [vmem:[%s1004_s1 + $0x250] sm:$0xff] }
  0x36   :  { %v98_v23 = vld [vmem:[%s1004_s1 + $0x260] sm:$0xff]  ;;  %v89_v25 = vld [vmem:[%s1004_s1 + $0x218] sm:$0xff]  ;;  %v91_v26 = vld [vmem:[%s1004_s1 + $0x228] sm:$0xff] }
  0x37   :  { %220 = vmatpush1.xpose.msra.mxu0 %v36_v56  ;;  %290 = vmatpush1.xpose.msra.mxu1 %v38_v57  ;;  %v90_v24 = vld [vmem:[%s1004_s1 + $0x220] sm:$0xff]  ;;  %v83_v27 = vld [vmem:[%s1004_s1 + $0x1e8] sm:$0xff]  ;;  %v84_v29 = vld [vmem:[%s1004_s1 + $0x1f0] sm:$0xff] }
  0x38   :  { %221 = vmatprep.subr.mxu0 %v30_v58  ;;  %291 = vmatprep.subr.mxu1 %v32_v59  ;;  %v82_v28 = vld [vmem:[%s1004_s1 + $0x1e0] sm:$0xff]  ;;  %v76_v30 = vld [vmem:[%s1004_s1 + $0x1b0] sm:$0xff]  ;;  %v75_v31 = vld [vmem:[%s1004_s1 + $0x1a8] sm:$0xff] }
  0x39   :  { %v77_v32 = vld [vmem:[%s1004_s1 + $0x1b8] sm:$0xff]  ;;  %v68_v34 = vld [vmem:[%s1004_s1 + $0x170] sm:$0xff]  ;;  %v70_v35 = vld [vmem:[%s1004_s1 + $0x180] sm:$0xff] }
  0x3a   :  { %v69_v33 = vld [vmem:[%s1004_s1 + $0x178] sm:$0xff]  ;;  %v62_v36 = vld [vmem:[%s1004_s1 + $0x140] sm:$0xff]  ;;  %v63_v38 = vld [vmem:[%s1004_s1 + $0x148] sm:$0xff] }
  0x3b   :  { %222 = vmatpush1.xpose.msra.mxu0 %v29_v60  ;;  %292 = vmatpush1.xpose.msra.mxu1 %v31_v61  ;;  %v61_v37 = vld [vmem:[%s1004_s1 + $0x138] sm:$0xff]  ;;  %v55_v39 = vld [vmem:[%s1004_s1 + $0x108] sm:$0xff]  ;;  %v54_v40 = vld [vmem:[%s1004_s1 + $0x100] sm:$0xff] }
  0x3c   :  { %223 = vmatprep.subr.mxu0 %v23_v62  ;;  %293 = vmatprep.subr.mxu1 %v25_v63  ;;  %v56_v41 = vld [vmem:[%s1004_s1 + $0x110] sm:$0xff]  ;;  %v47_v43 = vld [vmem:[%s1004_s1 + $0xc8] sm:$0xff]  ;;  %v49_v44 = vld [vmem:[%s1004_s1 + $0xd8] sm:$0xff] }
  0x3d   :  { %v48_v42 = vld [vmem:[%s1004_s1 + $0xd0] sm:$0xff]  ;;  %v41_v45 = vld [vmem:[%s1004_s1 + $0x98] sm:$0xff]  ;;  %v42_v47 = vld [vmem:[%s1004_s1 + $0xa0] sm:$0xff] }
  0x3e   :  { %v40_v46 = vld [vmem:[%s1004_s1 + $0x90] sm:$0xff]  ;;  %v34_v48 = vld [vmem:[%s1004_s1 + $0x60] sm:$0xff]  ;;  %v33_v49 = vld [vmem:[%s1004_s1 + $0x58] sm:$0xff] }
  0x3f   :  { %224 = vmatpush1.xpose.msra.mxu0 %v22_v0  ;;  %294 = vmatpush1.xpose.msra.mxu1 %v24_v1  ;;  %v35_v50 = vld [vmem:[%s1004_s1 + $0x68] sm:$0xff]  ;;  %v26_v52 = vld [vmem:[%s1004_s1 + $0x20] sm:$0xff]  ;;  %v28_v53 = vld [vmem:[%s1004_s1 + $0x30] sm:$0xff] }
  0x40   :  { %333 = vmatprep.subr.mxu0 %v132_v2  ;;  %523 = vmatprep.subr.mxu1 %v583_v5  ;;  %v27_v51 = vld [vmem:[%s1004_s1 + $0x28] sm:$0xff]  ;;  %v19_v54 = vld [vmem:[%s1003_s0 + $0x20] sm:$0xff]  ;;  %v21_v55 = vld [vmem:[%s1003_s0 + $0x30] sm:$0xff]  ;;  %s561_s0 = scalar_lea.vmem %s481_s9, 128 }
  0x41   :  { %v488_v60 = vld [vmem:[%s1005_s2] ss:$0 sm:$0xff]  ;;  %p562_p0 = scmp.ne.s32.totalorder %s481_s9, %s561_s0  ;;  %p567_p2 = scmp.lt.s32.totalorder %s561_s0, %s561_s0 }
  0x42   :  { %258 = vmatmul.mubr.f32.vlgmr.msra.gmra.mxu0 %v15_v3  ;;  %328 = vmatmul.mubr.f32.vlgmr.msra.gmra.mxu1 %v17_v4 }
  0x43   :  { %334 = vmatpush1.xpose.msra.mxu0 %v131_v6  ;;  %524 = vmatpush3.xpose.msk.msra.mxu1 %vm141_vm0, %v133_v7  ;;  %p568_p3 = por %p567_p2, %p566_p1 }
  0x44   :  { %335 = vmatprep.subr.mxu0 %v125_v8  ;;  %525 = vmatprep.subr.mxu1 %v583_v5 }
  0x45   :  { %397 = vmatprep.mubr.f32.mxu0 %v20_v9  ;;  %555 = vmatprep.mubr.msk.f32.mxu1 %vm584_vm1, %v583_v5  ;;  %p569_p4 = pnand %p568_p3, %p562_p0 }
  0x47   :  { %336 = vmatpush1.xpose.msra.mxu0 %v124_v10  ;;  %526 = vmatpush3.xpose.msk.msra.mxu1 %vm141_vm0, %v126_v11 }
  0x48   :  { %337 = vmatprep.subr.mxu0 %v118_v12  ;;  %527 = vmatprep.subr.mxu1 %v583_v5 }
  0x4b   :  { %338 = vmatpush1.xpose.msra.mxu0 %v117_v13  ;;  %528 = vmatpush3.xpose.msk.msra.mxu1 %vm141_vm0, %v119_v14 }
  0x4c   :  { %339 = vmatprep.subr.mxu0 %v111_v15  ;;  %529 = vmatprep.subr.mxu1 %v583_v5 }
  0x4f   :  { %340 = vmatpush1.xpose.msra.mxu0 %v110_v16  ;;  %530 = vmatpush3.xpose.msk.msra.mxu1 %vm141_vm0, %v112_v17 }
  0x50   :  { %341 = vmatprep.subr.mxu0 %v104_v18  ;;  %531 = vmatprep.subr.mxu1 %v583_v5 }
  0x53   :  { %342 = vmatpush1.xpose.msra.mxu0 %v103_v19  ;;  %532 = vmatpush3.xpose.msk.msra.mxu1 %vm141_vm0, %v105_v20 }
  0x54   :  { %343 = vmatprep.subr.mxu0 %v97_v21  ;;  %533 = vmatprep.subr.mxu1 %v583_v5 }
  0x57   :  { %344 = vmatpush1.xpose.msra.mxu0 %v96_v22  ;;  %534 = vmatpush3.xpose.msk.msra.mxu1 %vm141_vm0, %v98_v23 }
  0x58   :  { %345 = vmatprep.subr.mxu0 %v90_v24  ;;  %535 = vmatprep.subr.mxu1 %v583_v5 }
  0x5b   :  { %346 = vmatpush1.xpose.msra.mxu0 %v89_v25  ;;  %536 = vmatpush3.xpose.msk.msra.mxu1 %vm141_vm0, %v91_v26 }
  0x5c   :  { %347 = vmatprep.subr.mxu0 %v83_v27  ;;  %537 = vmatprep.subr.mxu1 %v583_v5 }
  0x5f   :  { %348 = vmatpush1.xpose.msra.mxu0 %v82_v28  ;;  %538 = vmatpush3.xpose.msk.msra.mxu1 %vm141_vm0, %v84_v29 }
  0x60   :  { %349 = vmatprep.subr.mxu0 %v76_v30  ;;  %539 = vmatprep.subr.mxu1 %v583_v5 }
  0x63   :  { %350 = vmatpush1.xpose.msra.mxu0 %v75_v31  ;;  %540 = vmatpush3.xpose.msk.msra.mxu1 %vm141_vm0, %v77_v32 }
  0x64   :  { %351 = vmatprep.subr.mxu0 %v69_v33  ;;  %541 = vmatprep.subr.mxu1 %v583_v5 }
  0x67   :  { %352 = vmatpush1.xpose.msra.mxu0 %v68_v34  ;;  %542 = vmatpush3.xpose.msk.msra.mxu1 %vm141_vm0, %v70_v35 }
  0x68   :  { %353 = vmatprep.subr.mxu0 %v62_v36  ;;  %543 = vmatprep.subr.mxu1 %v583_v5 }
  0x6b   :  { %354 = vmatpush1.xpose.msra.mxu0 %v61_v37  ;;  %544 = vmatpush3.xpose.msk.msra.mxu1 %vm141_vm0, %v63_v38 }
  0x6c   :  { %355 = vmatprep.subr.mxu0 %v55_v39  ;;  %545 = vmatprep.subr.mxu1 %v583_v5 }
  0x6f   :  { %356 = vmatpush1.xpose.msra.mxu0 %v54_v40  ;;  %546 = vmatpush3.xpose.msk.msra.mxu1 %vm141_vm0, %v56_v41 }
  0x70   :  { %357 = vmatprep.subr.mxu0 %v48_v42  ;;  %547 = vmatprep.subr.mxu1 %v583_v5 }
  0x73   :  { %358 = vmatpush1.xpose.msra.mxu0 %v47_v43  ;;  %548 = vmatpush3.xpose.msk.msra.mxu1 %vm141_vm0, %v49_v44 }
  0x74   :  { %359 = vmatprep.subr.mxu0 %v41_v45  ;;  %549 = vmatprep.subr.mxu1 %v583_v5 }
  0x77   :  { %360 = vmatpush1.xpose.msra.mxu0 %v40_v46  ;;  %550 = vmatpush3.xpose.msk.msra.mxu1 %vm141_vm0, %v42_v47 }
  0x78   :  { %361 = vmatprep.subr.mxu0 %v34_v48  ;;  %551 = vmatprep.subr.mxu1 %v583_v5 }
  0x7b   :  { %362 = vmatpush1.xpose.msra.mxu0 %v33_v49  ;;  %552 = vmatpush3.xpose.msk.msra.mxu1 %vm141_vm0, %v35_v50 }
  0x7c   :  { %363 = vmatprep.subr.mxu0 %v27_v51  ;;  %553 = vmatprep.subr.mxu1 %v583_v5 }
  0x7f   :  { %364 = vmatpush1.xpose.msra.mxu0 %v26_v52  ;;  %554 = vmatpush3.xpose.msk.msra.mxu1 %vm141_vm0, %v28_v53 }
  0x82   :  { %398 = vmatmul.mubr.f32.vlgmr.msra.gmra.mxu0 %v19_v54  ;;  %556 = vmatmul.mubr.msk.f32.vlgmr.msra.gmra.mxu1 %vm141_vm0, %v21_v55 }
 0x102   :  { %v259_v56 = vpop.f32.mrf.mxu0  ;;  %v329_v57 = vpop.f32.mrf.mxu1 }
 0x103   :  { %v260_v61 = vadd.f32 %v488_v60, %v259_v56 }
 0x104   :  { %v261_v58 = vpop.f32.mrf.mxu0  ;;  %v331_v59 = vpop.f32.mrf.mxu1 }
 0x105   :  { %v330_v62 = vadd.f32 %v329_v57, %v260_v61 }
 0x142   :  { %v399_v63 = vpop.f32.mrf.mxu0  ;;  %v469_v0 = vpop.f32.mrf.mxu1 }
 0x143   :  { %v400_v1 = vadd.f32 %v399_v63, %v330_v62 }
 0x144   :  { %v401_v2 = vpop.f32.mrf.mxu0  ;;  %v557_v3 = vpop.f32.mrf.mxu1 }
 0x145   :  { %v470_v4 = vadd.f32 %v469_v0, %v400_v1 }
 0x147   :  { %473 = vst [vmem:[#allocation2] sm:$0xff] %v470_v4 }
 0x148   :  { %572 = shalt.err (!%p569_p4)
}
 0x149   :  { %483 = dma.vmem_to_hbm [thread:$0]  %s481_s9, 128, %s1006_s3, [#allocation3]  }
 0x14a   :  { %581 = dma.done.wait [#allocation3], 128  }
 0x14b   :  { %582 = vsyncadd [#allocation3], 4294967168 }
 0x14c   :  { %487 = vsyncpa [#allocation3], 1 }

</bundles_post_ra>
